<compile_context>
chip_gen: v5e
topology: v5e:2x2
jax: 0.10.0
libtpu: 0.0.40
codegen_flags: <defaults>
</compile_context>

<pallas_src>
import functools

import jax
import jax.numpy as jnp
from jax.experimental import pallas as pl
from jax.experimental.pallas import tpu as pltpu


def _ffn_kernel(x_ref, w1_ref, b1_ref, w2_ref, b2_ref, w3_ref, b3_ref,
                o_ref, acc_ref):
    f = pl.program_id(1)

    @pl.when(f == 0)
    def _init():
        acc_ref[...] = jnp.zeros_like(acc_ref)

    x = x_ref[...]
    # Gate branch on this d_ff slice: x @ w1[:, f] + b1[f]   (MXU, f32 acc)
    h1 = jnp.dot(x, w1_ref[...], preferred_element_type=jnp.float32) + b1_ref[...]
    # Up branch on this d_ff slice: x @ w2[:, f] + b2[f]
    h2 = jnp.dot(x, w2_ref[...], preferred_element_type=jnp.float32) + b2_ref[...]
    # SiLU(h1) * h2 in f32 (sigmoid -> EUP, multiplies -> VPU).
    h = (h1 * jax.nn.sigmoid(h1)) * h2
    # Partial down projection for this d_ff slice, accumulated in f32.
    acc_ref[...] += jnp.dot(h.astype(w3_ref.dtype), w3_ref[...],
                            preferred_element_type=jnp.float32)

    @pl.when(f == pl.num_programs(1) - 1)
    def _finalize():
        o_ref[...] = (acc_ref[...] + b3_ref[...]).astype(o_ref.dtype)


def _fit_tile(requested, dim):
    """Largest tile <= requested that evenly divides dim (or dim itself)."""
    if dim <= requested:
        return dim
    t = requested
    while dim % t != 0:
        t -= 1
    return t


@functools.partial(jax.jit, static_argnames=("tm", "tf"))
def llama2_feedforward(x, w1, b1, w2, b2, w3, b3, *, tm=256, tf=512):
    """x: [batch, seq, d_model] -> [batch, seq, d_model]."""
    batch, seq, d_model = x.shape
    d_ff = w1.shape[1]
    n = batch * seq

    tm = _fit_tile(tm, n)      # row tile
    tf = _fit_tile(tf, d_ff)   # d_ff tile

    x2d = x.reshape(n, d_model)
    b1_2d = b1.reshape(1, d_ff)
    b2_2d = b2.reshape(1, d_ff)
    b3_2d = b3.reshape(1, d_model)

    grid = (n // tm, d_ff // tf)

    # --- VMEM budget: only raise the scoped limit if the tiles need it. ---
    w_bytes = jnp.dtype(w1.dtype).itemsize
    act_bytes = jnp.dtype(x.dtype).itemsize
    est = (
        2 * (  # double-buffered streamed blocks
            2 * tm * d_model * act_bytes              # x tile + out tile
            + (2 * d_model * tf + tf * d_model) * w_bytes  # w1/w2/w3 slices
            + (2 * tf + d_model) * 4                  # bias slices
        )
        + tm * d_model * 4                            # f32 accumulator
        + 3 * tm * tf * 4                             # f32 temporaries h1/h2/h
    )
    vmem_limit = None
    if est > (32 << 20):
        # TODO(synk): cap nearer ~48 MiB when targeting v7x (64 MiB VMEM/TC).
        vmem_limit = min(int(est * 1.25), 100 << 20)

    # --- Advisory cost estimate for the XLA scheduler. ---
    flops = 6 * n * d_model * d_ff  # 2 up-proj matmuls + 1 down-proj, 2*M*N*K each
    bytes_accessed = (
        (2 * d_model * d_ff + d_ff * d_model) * w_bytes   # weights streamed once
        + 2 * n * d_model * act_bytes                      # x in, out written
        + (2 * d_ff + d_model) * 4                         # biases
    )
    cost = pl.CostEstimate(flops=flops, transcendentals=n * d_ff,
                           bytes_accessed=bytes_accessed)

    out2d = pl.pallas_call(
        _ffn_kernel,
        out_shape=jax.ShapeDtypeStruct((n, d_model), x.dtype),
        grid_spec=pltpu.PrefetchScalarGridSpec(
            num_scalar_prefetch=0,
            grid=grid,
            in_specs=[
                pl.BlockSpec((tm, d_model), lambda i, f: (i, 0)),   # x rows
                pl.BlockSpec((d_model, tf), lambda i, f: (0, f)),   # w1 slice
                pl.BlockSpec((1, tf), lambda i, f: (0, f)),         # b1 slice
                pl.BlockSpec((d_model, tf), lambda i, f: (0, f)),   # w2 slice
                pl.BlockSpec((1, tf), lambda i, f: (0, f)),         # b2 slice
                pl.BlockSpec((tf, d_model), lambda i, f: (f, 0)),   # w3 slice
                pl.BlockSpec((1, d_model), lambda i, f: (0, 0)),    # b3
            ],
            out_specs=pl.BlockSpec((tm, d_model), lambda i, f: (i, 0)),
            scratch_shapes=[pltpu.VMEM((tm, d_model), jnp.float32)],
        ),
        compiler_params=pltpu.CompilerParams(
            dimension_semantics=("parallel", "arbitrary"),
            vmem_limit_bytes=vmem_limit),
        cost_estimate=cost,
    )(x2d, w1, b1_2d, w2, b2_2d, w3, b3_2d)

    return out2d.reshape(batch, seq, d_model)


def _reference(x, w1, b1, w2, b2, w3, b3):
    h1 = x @ w1 + b1
    h2 = x @ w2 + b2
    h = (h1 * jax.nn.sigmoid(h1)) * h2
    return h @ w3 + b3


if __name__ == "__main__":
    batch, seq, d_model, d_ff = 2, 8, 32, 64
    key = jax.random.PRNGKey(0)
    kx, k1, kb1, k2, kb2, k3, kb3 = jax.random.split(key, 7)

    x = jax.random.normal(kx, (batch, seq, d_model), dtype=jnp.float32)
    # Deterministic synthetic parameters (nn.Linear weights, pre-transposed).
    w1 = jax.random.normal(k1, (d_model, d_ff), dtype=jnp.float32) * 0.05
    b1 = jax.random.normal(kb1, (d_ff,), dtype=jnp.float32) * 0.05
    w2 = jax.random.normal(k2, (d_model, d_ff), dtype=jnp.float32) * 0.05
    b2 = jax.random.normal(kb2, (d_ff,), dtype=jnp.float32) * 0.05
    w3 = jax.random.normal(k3, (d_ff, d_model), dtype=jnp.float32) * 0.05
    b3 = jax.random.normal(kb3, (d_model,), dtype=jnp.float32) * 0.05

    out = llama2_feedforward(x, w1, b1, w2, b2, w3, b3)
    out = jax.block_until_ready(out)

    ref = _reference(x, w1, b1, w2, b2, w3, b3)
    assert out.shape == (batch, seq, d_model)
    assert jnp.allclose(out, ref, atol=1e-5, rtol=1e-5), "mismatch vs reference"

    print("KERNEL_OK")
</pallas_src>

<mosaic_0001>
module attributes {stable_mosaic.version = 11 : i64} {
  func.func @_ffn_kernel(%arg0: i32, %arg1: i32, %arg2: memref<16x32xf32, #tpu.memory_space<vmem>>, %arg3: memref<32x64xf32, #tpu.memory_space<vmem>>, %arg4: memref<1x64xf32, #tpu.memory_space<vmem>>, %arg5: memref<32x64xf32, #tpu.memory_space<vmem>>, %arg6: memref<1x64xf32, #tpu.memory_space<vmem>>, %arg7: memref<64x32xf32, #tpu.memory_space<vmem>>, %arg8: memref<1x32xf32, #tpu.memory_space<vmem>>, %arg9: memref<16x32xf32, #tpu.memory_space<vmem>>, %arg10: memref<16x32xf32, #tpu.memory_space<vmem>>) attributes {dimension_semantics = [#tpu.dimension_semantics<parallel>, #tpu.dimension_semantics<arbitrary>], iteration_bounds = array<i64: 1, 1>, scalar_prefetch = 0 : i64, scratch_operands = 1 : i64, tpu.core_type = #tpu.core_type<tc>, window_params = [{transform_indices = @transform_0, window_bounds = array<i64: 16, 32>}, {transform_indices = @transform_1, window_bounds = array<i64: 32, 64>}, {transform_indices = @transform_2, window_bounds = array<i64: 1, 64>}, {transform_indices = @transform_3, window_bounds = array<i64: 32, 64>}, {transform_indices = @transform_4, window_bounds = array<i64: 1, 64>}, {transform_indices = @transform_5, window_bounds = array<i64: 64, 32>}, {pipeline_mode = #tpu.pipeline_mode<synchronous>, transform_indices = @transform_6, window_bounds = array<i64: 1, 32>}, {transform_indices = @transform_7, window_bounds = array<i64: 16, 32>}]} {
    %c0_i32 = arith.constant 0 : i32
    %0 = arith.cmpi eq, %arg1, %c0_i32 : i32
    %1 = arith.extui %0 : i1 to i32
    %c0_i32_0 = arith.constant 0 : i32
    %2 = arith.cmpi ne, %1, %c0_i32_0 : i32
    scf.if %2 {
      %cst_21 = arith.constant 0.000000e+00 : f32
      %29 = vector.broadcast %cst_21 : f32 to vector<16x32xf32>
      %c0_22 = arith.constant 0 : index
      %c0_23 = arith.constant 0 : index
      %30 = vector.load %arg10[%c0_22, %c0_23] : memref<16x32xf32, #tpu.memory_space<vmem>>, vector<16x32xf32>
      tpu.vector_store %arg10[%c0_22, %c0_23], %29 {strides = array<i32>} : memref<16x32xf32, #tpu.memory_space<vmem>>, vector<16x32xf32>,
    } else {
    }
    %c0 = arith.constant 0 : index
    %c0_1 = arith.constant 0 : index
    %3 = vector.load %arg2[%c0, %c0_1] : memref<16x32xf32, #tpu.memory_space<vmem>>, vector<16x32xf32>
    %c0_2 = arith.constant 0 : index
    %c0_3 = arith.constant 0 : index
    %4 = vector.load %arg3[%c0_2, %c0_3] : memref<32x64xf32, #tpu.memory_space<vmem>>, vector<32x64xf32>
    %cst = arith.constant dense<0.000000e+00> : vector<16x64xf32>
    %5 = tpu.matmul %3, %4, %cst {dimension_numbers = #tpu.dot_dimension_numbers<[1], [0], [0], [1], [0, 0, 1, 1], [], []>} : vector<16x32xf32>, vector<32x64xf32>, vector<16x64xf32> -> vector<16x64xf32>
    %c0_4 = arith.constant 0 : index
    %c0_5 = arith.constant 0 : index
    %6 = vector.load %arg4[%c0_4, %c0_5] : memref<1x64xf32, #tpu.memory_space<vmem>>, vector<1x64xf32>
    %7 = vector.broadcast %6 : vector<1x64xf32> to vector<16x64xf32>
    %8 = arith.addf %5, %7 : vector<16x64xf32>
    %c0_6 = arith.constant 0 : index
    %c0_7 = arith.constant 0 : index
    %9 = vector.load %arg5[%c0_6, %c0_7] : memref<32x64xf32, #tpu.memory_space<vmem>>, vector<32x64xf32>
    %cst_8 = arith.constant dense<0.000000e+00> : vector<16x64xf32>
    %10 = tpu.matmul %3, %9, %cst_8 {dimension_numbers = #tpu.dot_dimension_numbers<[1], [0], [0], [1], [0, 0, 1, 1], [], []>} : vector<16x32xf32>, vector<32x64xf32>, vector<16x64xf32> -> vector<16x64xf32>
    %c0_9 = arith.constant 0 : index
    %c0_10 = arith.constant 0 : index
    %11 = vector.load %arg6[%c0_9, %c0_10] : memref<1x64xf32, #tpu.memory_space<vmem>>, vector<1x64xf32>
    %12 = vector.broadcast %11 : vector<1x64xf32> to vector<16x64xf32>
    %13 = arith.addf %10, %12 : vector<16x64xf32>
    %14 = arith.negf %8 : vector<16x64xf32>
    %15 = math.exp %14 : vector<16x64xf32>
    %cst_11 = arith.constant 1.000000e+00 : f32
    %16 = vector.broadcast %cst_11 : f32 to vector<16x64xf32>
    %17 = arith.addf %16, %15 : vector<16x64xf32>
    %18 = arith.divf %16, %17 : vector<16x64xf32>
    %19 = arith.mulf %8, %18 : vector<16x64xf32>
    %20 = arith.mulf %19, %13 : vector<16x64xf32>
    %c0_12 = arith.constant 0 : index
    %c0_13 = arith.constant 0 : index
    %21 = vector.load %arg10[%c0_12, %c0_13] : memref<16x32xf32, #tpu.memory_space<vmem>>, vector<16x32xf32>
    %c0_14 = arith.constant 0 : index
    %c0_15 = arith.constant 0 : index
    %22 = vector.load %arg7[%c0_14, %c0_15] : memref<64x32xf32, #tpu.memory_space<vmem>>, vector<64x32xf32>
    %cst_16 = arith.constant dense<0.000000e+00> : vector<16x32xf32>
    %23 = tpu.matmul %20, %22, %cst_16 {dimension_numbers = #tpu.dot_dimension_numbers<[1], [0], [0], [1], [0, 0, 1, 1], [], []>} : vector<16x64xf32>, vector<64x32xf32>, vector<16x32xf32> -> vector<16x32xf32>
    %24 = arith.addf %21, %23 : vector<16x32xf32>
    %c0_17 = arith.constant 0 : index
    %c0_18 = arith.constant 0 : index
    %25 = vector.load %arg10[%c0_17, %c0_18] : memref<16x32xf32, #tpu.memory_space<vmem>>, vector<16x32xf32>
    tpu.vector_store %arg10[%c0_17, %c0_18], %24 {strides = array<i32>} : memref<16x32xf32, #tpu.memory_space<vmem>>, vector<16x32xf32>,
    %c0_i32_19 = arith.constant 0 : i32
    %26 = arith.cmpi eq, %arg1, %c0_i32_19 : i32
    %27 = arith.extui %26 : i1 to i32
    %c0_i32_20 = arith.constant 0 : i32
    %28 = arith.cmpi ne, %27, %c0_i32_20 : i32
    scf.if %28 {
      %c0_21 = arith.constant 0 : index
      %c0_22 = arith.constant 0 : index
      %29 = vector.load %arg10[%c0_21, %c0_22] : memref<16x32xf32, #tpu.memory_space<vmem>>, vector<16x32xf32>
      %c0_23 = arith.constant 0 : index
      %c0_24 = arith.constant 0 : index
      %30 = vector.load %arg8[%c0_23, %c0_24] : memref<1x32xf32, #tpu.memory_space<vmem>>, vector<1x32xf32>
      %31 = vector.broadcast %30 : vector<1x32xf32> to vector<16x32xf32>
      %32 = arith.addf %29, %31 : vector<16x32xf32>
      %c0_25 = arith.constant 0 : index
      %c0_26 = arith.constant 0 : index
      %33 = vector.load %arg9[%c0_25, %c0_26] : memref<16x32xf32, #tpu.memory_space<vmem>>, vector<16x32xf32>
      tpu.vector_store %arg9[%c0_25, %c0_26], %32 {strides = array<i32>} : memref<16x32xf32, #tpu.memory_space<vmem>>, vector<16x32xf32>,
    } else {
    }
    return
  }
  func.func @transform_0(%arg0: i32, %arg1: i32) -> (i32, i32) {
    %c0_i32 = arith.constant 0 : i32
    %c0_i32_0 = arith.constant 0 : i32
    return %arg0, %c0_i32 : i32, i32
  }
  func.func @transform_1(%arg0: i32, %arg1: i32) -> (i32, i32) {
    %c0_i32 = arith.constant 0 : i32
    %c0_i32_0 = arith.constant 0 : i32
    return %c0_i32, %arg1 : i32, i32
  }
  func.func @transform_2(%arg0: i32, %arg1: i32) -> (i32, i32) {
    %c0_i32 = arith.constant 0 : i32
    %c0_i32_0 = arith.constant 0 : i32
    return %c0_i32, %arg1 : i32, i32
  }
  func.func @transform_3(%arg0: i32, %arg1: i32) -> (i32, i32) {
    %c0_i32 = arith.constant 0 : i32
    %c0_i32_0 = arith.constant 0 : i32
    return %c0_i32, %arg1 : i32, i32
  }
  func.func @transform_4(%arg0: i32, %arg1: i32) -> (i32, i32) {
    %c0_i32 = arith.constant 0 : i32
    %c0_i32_0 = arith.constant 0 : i32
    return %c0_i32, %arg1 : i32, i32
  }
  func.func @transform_5(%arg0: i32, %arg1: i32) -> (i32, i32) {
    %c0_i32 = arith.constant 0 : i32
    %c0_i32_0 = arith.constant 0 : i32
    return %arg1, %c0_i32 : i32, i32
  }
  func.func @transform_6(%arg0: i32, %arg1: i32) -> (i32, i32) {
    %c0_i32 = arith.constant 0 : i32
    %c0_i32_0 = arith.constant 0 : i32
    %c0_i32_1 = arith.constant 0 : i32
    return %c0_i32, %c0_i32_0 : i32, i32
  }
  func.func @transform_7(%arg0: i32, %arg1: i32) -> (i32, i32) {
    %c0_i32 = arith.constant 0 : i32
    %c0_i32_0 = arith.constant 0 : i32
    return %arg0, %c0_i32 : i32, i32
  }
}

</mosaic_0001>

<bundles_post_ra>
// kernel: llama2_feedforward.1
= control target key start
LH: loop header
LB: loop body
LE: loop exit
PB: predicated region body
PF: predicated region fallthrough
CT: control target
= control target key end

     0   :  { %s401_s0 = inlined_call_operand.vmem [shape: f32[16,32], index: 0, kind: input, shape index: {}]   ;;  %s402_s1 = inlined_call_operand.vmem [shape: f32[32,64], index: 1, kind: input, shape index: {}]   ;;  %s403_s2 = inlined_call_operand.vmem [shape: f32[1,64], index: 2, kind: input, shape index: {}]   ;;  %s404_s3 = inlined_call_operand.vmem [shape: f32[32,64], index: 3, kind: input, shape index: {}]   ;;  %s405_s4 = inlined_call_operand.vmem [shape: f32[1,64], index: 4, kind: input, shape index: {}]   ;;  %s406_s5 = inlined_call_operand.vmem [shape: f32[64,32], index: 5, kind: input, shape index: {}]   ;;  %s407_s6 = inlined_call_operand.vmem [shape: f32[1,32], index: 6, kind: input, shape index: {}]   ;;  %s408_s7 = inlined_call_operand.hbm [shape: f32[16,32], index: 7, kind: output, shape index: {}]  }
   0x1   :  { %v39_v0 = vld [vmem:[%s402_s1 + $0x18] sm:$0xff]  ;;  %v38_v1 = vld [vmem:[%s402_s1 + $0x10] sm:$0xff]  ;;  %v37_v2 = vld [vmem:[%s402_s1 + $0x8] sm:$0xff] }
   0x2   :  { %63 = vmatpush.msra.mxu0 %v39_v0  ;;  %v77_v3 = vld [vmem:[%s404_s3 + $0x18] sm:$0xff]  ;;  %v76_v4 = vld [vmem:[%s404_s3 + $0x10] sm:$0xff]  ;;  %v36_v5 = vld [vmem:[%s402_s1] sm:$0xff] }
   0x3   :  { %94 = vmatpush.msra.mxu1 %v77_v3  ;;  %v75_v6 = vld [vmem:[%s404_s3 + $0x8] sm:$0xff] }
   0x4   :  { %64 = vmatpush.msra.mxu0 %v38_v1 }
   0x5   :  { %12 = vsyncpa [#allocation4], 0  ;;  %vm31_vm0 = vcmask 261120   ;;  %v34_v7 = vld [vmem:[%s401_s0] sm:$0xff]  ;;  %95 = vmatpush.msra.mxu1 %v76_v4  ;;  %v35_v9 = vld [vmem:[%s401_s0 + $0x8] sm:$0xff]  ;;  %v279_v27 = vmov 0.0  }
   0x6   :  { %65 = vmatpush.msra.mxu0 %v37_v2  ;;  %v74_v8 = vld [vmem:[%s404_s3] sm:$0xff]  ;;  %v156_v10 = vld [vmem:[%s406_s5 + $0x38] sm:$0xff]  ;;  %v155_v11 = vld [vmem:[%s406_s5 + $0x30] sm:$0xff]  ;;  %32 = vst.msk [vmem:[#allocation2] sm:$0xff] %vm31_vm0, %v279_v27  ;;  %vm157_vm5 = vcmask 523264   ;;  %s280_s14 = smov [#allocation3]  }
   0x7   :  { %96 = vmatpush.msra.mxu1 %v75_v6  ;;  %172 = vmatpush.msra.mxu2 %v156_v10  ;;  %v154_v12 = vld [vmem:[%s406_s5 + $0x28] sm:$0xff]  ;;  %v153_v13 = vld [vmem:[%s406_s5 + $0x20] sm:$0xff]  ;;  %v152_v14 = vld [vmem:[%s406_s5 + $0x18] sm:$0xff]  ;;  %33 = vst.msk [vmem:[#allocation2 + $0x8] sm:$0xff] %vm31_vm0, %v279_v27  ;;  %s208_s15 = sshll.u32 %s280_s14, 4  ;;  %s210_s18 = sshll.u32 %s408_s7, 4  ;;  %s209_s15 = int_to_ptr.vmem [resolvable:$true] %s208_s15  ;;  %s211_s18 = int_to_ptr.hbm [resolvable:$true] %s210_s18 }
   0x8   :  { %66 = vmatpush.msra.mxu0 %v36_v5  ;;  %230 = vmatpush.msra.mxu3 %v156_v10  ;;  %v242_v15 = vld [vmem:[%s403_s2] ss:$0 sm:$0xff]  ;;  %v151_v16 = vld [vmem:[%s406_s5 + $0x10] sm:$0xff]  ;;  %v150_v17 = vld [vmem:[%s406_s5 + $0x8] sm:$0xff]  ;;  %s282_s1 = smov 8  }
   0x9   :  { %222 = vmatmul.msk.f32.vlgmr.msra.gmra.mxu0 %vm31_vm0, %v34_v7  ;;  %97 = vmatpush.msra.mxu1 %v74_v8  ;;  %v149_v20 = vld [vmem:[%s406_s5] sm:$0xff] }
   0xa   :  { %224 = vmatmul.msk.f32.vlgmr.msra.gmra.mxu1 %vm31_vm0, %v34_v7  ;;  %173 = vmatpush.msra.mxu2 %v155_v11  ;;  %v243_v37 = vld [vmem:[%s405_s4] ss:$0 sm:$0xff] }
   0xb   :  { %231 = vmatpush.msra.mxu3 %v155_v11  ;;  %v244_v63 = vld [vmem:[%s407_s6] ss:$0 sm:$0xff]  ;;  %s281_s6 = smov 128  }
   0xc   :  { %174 = vmatpush.msra.mxu2 %v154_v12 }
   0xd   :  { %232 = vmatpush.msra.mxu3 %v154_v12  ;;  %v147_v59 = vld [vmem:[#allocation2] sm:$0xff] }
   0xe   :  { %175 = vmatpush.msra.mxu2 %v153_v13  ;;  %v148_v62 = vld [vmem:[#allocation2 + $0x8] sm:$0xff] }
   0xf   :  { %233 = vmatpush.msra.mxu3 %v153_v13 }
  0x10   :  { %176 = vmatpush.msra.mxu2 %v152_v14 }
  0x11   :  { %223 = vmatmul.msk.f32.gmra.mxu0 %vm31_vm0, %v35_v9  ;;  %234 = vmatpush.msra.mxu3 %v152_v14 }
  0x12   :  { %225 = vmatmul.msk.f32.gmra.mxu1 %vm31_vm0, %v35_v9  ;;  %177 = vmatpush.msra.mxu2 %v151_v16 }
  0x13   :  { %235 = vmatpush.msra.mxu3 %v151_v16 }
  0x14   :  { %178 = vmatpush.msra.mxu2 %v150_v17 }
  0x15   :  { %236 = vmatpush.msra.mxu3 %v150_v17 }
  0x16   :  { %179 = vmatpush.msra.mxu2 %v149_v20 }
  0x17   :  { %237 = vmatpush.msra.mxu3 %v149_v20 }
  0x86   :  { %v68_v18 = vpop.f32.mrf.mxu0 }
  0x87   :  { %v69_v19 = vadd.f32 %v242_v15, %v68_v18  ;;  %v99_v34 = vpop.f32.mrf.mxu1 }
  0x88   :  { %v100_v43 = vadd.f32 %v243_v37, %v99_v34 }
  0x89   :  { %v226_v21 = vmul.f32 -1.442695, %v69_v19 }
  0x8b   :  { %245 = vpow2.f32 %v226_v21 }
  0x8e   :  { %v71_v22 = vpop.f32.mrf.mxu0 }
  0x8f   :  { %v72_v23 = vadd.f32 %v242_v15, %v71_v22  ;;  %v102_v51 = vpop.f32.mrf.mxu1 }
  0x90   :  { %v103_v55 = vadd.f32 %v243_v37, %v102_v51 }
  0x91   :  { %v246_v24 = vpop.eup %245  ;;  %v227_v25 = vmul.f32 -1.442695, %v72_v23 }
  0x92   :  { %v111_v26 = vadd.f32 1.0, %v246_v24 }
  0x93   :  { %247 = vpow2.f32 %v227_v25 }
  0x94   :  { %249 = vrcp.f32 %v111_v26  ;;  %v124_v33 = vand.u32 2147483648, %v111_v26  ;;  %v122_v36 = vand.u32 2147483647, %v111_v26  ;;  %vm118_vm2 = vweird.f32 %v111_v26 }
  0x96   :  { %v125_v40 = vor.u32 1.1754944e-38, %v124_v33  ;;  %vm123_vm4 = vcmp.eq.f32.partialorder %v122_v36, 8.507059e+37 }
  0x99   :  { %v248_v28 = vpop.eup %247 }
  0x9a   :  { %v250_v29 = vpop.eup %249  ;;  %v112_v30 = vadd.f32 1.0, %v248_v28 }
  0x9b   :  { %v114_v31 = vmul.f32 %v250_v29, %v111_v26  ;;  %vm119_vm1 = vweird.f32 %v250_v29 }
  0x9c   :  { %251 = vrcp.f32 %v112_v30  ;;  %vm120_vm3 = vmor %vm118_vm2, %vm119_vm1  ;;  %v139_v47 = vand.u32 2147483648, %v112_v30  ;;  %v137_v49 = vand.u32 2147483647, %v112_v30  ;;  %vm133_vm7 = vweird.f32 %v112_v30 }
  0x9d   :  { %v115_v32 = vsub.f32 1.0, %v114_v31 }
  0x9e   :  { %v140_v53 = vor.u32 1.1754944e-38, %v139_v47  ;;  %vm138_vm9 = vcmp.eq.f32.partialorder %v137_v49, 8.507059e+37 }
  0x9f   :  { %v116_v35 = vmul.f32 %v250_v29, %v115_v32 }
  0xa1   :  { %v117_v38 = vadd.f32 %v250_v29, %v116_v35 }
  0xa2   :  { %v252_v39 = vpop.eup %251 }
  0xa3   :  { %v121_v41 = vsel %vm120_vm3, %v250_v29, %v117_v38  ;;  %v129_v42 = vmul.f32 %v252_v39, %v112_v30  ;;  %vm134_vm6 = vweird.f32 %v252_v39 }
  0xa4   :  { %v126_v44 = vsel %vm123_vm4, %v125_v40, %v121_v41  ;;  %vm135_vm8 = vmor %vm133_vm7, %vm134_vm6 }
  0xa5   :  { %v143_v45 = vmul.f32 %v126_v44, %v69_v19  ;;  %v130_v46 = vsub.f32 1.0, %v129_v42 }
  0xa7   :  { %v131_v48 = vmul.f32 %v252_v39, %v130_v46  ;;  %v145_v50 = vmul.f32 %v143_v45, %v100_v43 }
  0xa9   :  { %v132_v52 = vadd.f32 %v252_v39, %v131_v48  ;;  %228 = vmatmul.msk.f32.vlgmr.msra.gmra.mxu2 %vm157_vm5, %v145_v50 }
  0xab   :  { %v136_v54 = vsel %vm135_vm8, %v252_v39, %v132_v52 }
  0xac   :  { %v141_v56 = vsel %vm138_vm9, %v140_v53, %v136_v54 }
  0xad   :  { %v144_v57 = vmul.f32 %v141_v56, %v72_v23 }
  0xaf   :  { %v146_v58 = vmul.f32 %v144_v57, %v103_v55 }
  0xb1   :  { %229 = vmatmul.msk.f32.vlgmr.msra.gmra.mxu3 %vm157_vm5, %v146_v58 }
 0x12c   :  { %v181_v60 = vpop.f32.mrf.mxu2 }
 0x12d   :  { %v187_v61 = vadd.f32 %v181_v60, %v147_v59 }
 0x12f   :  { %189 = vst.msk [vmem:[#allocation2] sm:$0xff] %vm31_vm0, %v187_v61 }
 0x134   :  { %v184_v0 = vpop.f32.mrf.mxu3 }
 0x135   :  { %v188_v1 = vadd.f32 %v184_v0, %v148_v62 }
 0x136   :  { %v194_v2 = vld [vmem:[#allocation2] sm:$0xff] }
 0x137   :  { %190 = vst.msk [vmem:[#allocation2 + $0x8] sm:$0xff] %vm31_vm0, %v188_v1  ;;  %v200_v3 = vadd.f32 %v244_v63, %v194_v2 }
 0x139   :  { %202 = vst.msk [vmem:[#allocation3] sm:$0xff] %vm31_vm0, %v200_v3 }
 0x13e   :  { %v195_v4 = vld [vmem:[#allocation2 + $0x8] sm:$0xff] }
 0x13f   :  { %v201_v5 = vadd.f32 %v244_v63, %v195_v4 }
 0x141   :  { %203 = vst.msk [vmem:[#allocation3 + $0x8] sm:$0xff] %vm31_vm0, %v201_v5 }
 0x142   :  { %216 = dma.vmem_to_hbm [thread:$0]  %s209_s15, 256, %s211_s18, [#allocation4], %s281_s6, %s281_s6, %s282_s1  }
 0x143   :  { %277 = dma.done.wait [#allocation4], 256  }
 0x144   :  { %278 = vsyncadd [#allocation4], 4294967040 }
 0x145   :  { %221 = vsyncpa [#allocation4], 1 }

</bundles_post_ra>
